<compile_context>
chip_gen: v5e
topology: v5e:2x2
jax: 0.10.0
libtpu: 0.0.40
codegen_flags: <defaults>
</compile_context>

<pallas_src>
import math

import jax
import jax.numpy as jnp
from jax import lax
from jax.experimental import pallas as pl
from jax.experimental.pallas import tpu as pltpu


# ---------------------------------------------------------------------------
# Generation-aware sizing helpers
# ---------------------------------------------------------------------------

def _vmem_capacity_bytes() -> int:
    """Physical per-core VMEM (128 MiB on v5e/v6e, 64 MiB on v7x)."""
    try:
        info = pltpu.get_tpu_info()
        for name in ("vmem_capacity_bytes", "vmem_size_bytes", "vmem_bytes"):
            v = getattr(info, name, None)
            if v:
                return int(v)
    except Exception:
        pass
    return 128 * 1024 * 1024


def _attn_step_bytes(tq: int, n: int, d: int) -> int:
    """Per-grid-step VMEM bytes for the attention kernel (bf16 operands),
    including the in-kernel (TQ, N) f32 temporaries the review flagged."""
    bf, f32 = 2, 4
    x_blk = 2 * n * d * bf                               # (1,N,D) input, double-buffered
    w_blk = 2 * 3 * d * d * bf                           # (3,D,D) weights
    kv_scr = 2 * n * d * bf                              # K,V scratch (single-buffered)
    out_blk = 2 * (2 * tq * n * f32 + tq * d * bf)       # energy, attn, ctx blocks
    temps = 3 * tq * n * f32 + 3 * tq * d * f32          # e, p, softmax / q / ctx temps
    return x_blk + w_blk + kv_scr + out_blk + temps


def _fc_step_bytes(tq: int, e: int) -> int:
    bf, f32 = 2, 4
    return 2 * (tq * e * bf + e * e * bf + e * f32 + tq * e * f32) + tq * e * f32


def _pick_tile(n: int, max_t: int, fits) -> int:
    """Largest multiple-of-8 divisor of n that is <= max_t and fits the VMEM
    budget; falls back to n (full extent, always BlockSpec-legal)."""
    if n <= max_t and fits(n):
        return n
    best = None
    t = 8
    while t <= min(max_t, n):
        if n % t == 0 and fits(t):
            best = t
        t += 8
    return best if best is not None else n


# ---------------------------------------------------------------------------
# Kernel 1: per-head attention (energy, softmax, ctx = A @ V)
# ---------------------------------------------------------------------------

def make_pair_attention_kernel(embed_size: int, tq: int):
    scale = 1.0 / math.sqrt(embed_size)

    def kernel(x_ref, w_ref, energy_ref, attn_ref, ctx_ref, k_ref, v_ref):
        # x_ref:    (1, N, D)  all rows of head h (compute dtype, e.g. bf16)
        # w_ref:    (3, D, D)  stacked [Wq^T, Wk^T, Wv^T]
        # energy_ref/attn_ref: (1, TQ, N) f32 outputs
        # ctx_ref:  (1, TQ, D) compute-dtype output (per-head context rows)
        # k_ref/v_ref: (N, D) VMEM scratch, compute dtype
        qi = pl.program_id(1)

        # Project K / V once per head (query-tile axis is inner + "arbitrary").
        @pl.when(qi == 0)
        def _():
            x = x_ref[0]                                              # (N, D)
            k_ref[...] = jnp.dot(
                x, w_ref[1], preferred_element_type=jnp.float32).astype(k_ref.dtype)
            v_ref[...] = jnp.dot(
                x, w_ref[2], preferred_element_type=jnp.float32).astype(v_ref.dtype)

        # Query rows come from the same resident x block (no separate xq stream).
        start = pl.multiple_of(qi * tq, tq)
        xq = x_ref[0, pl.ds(start, tq), :]                            # (TQ, D)
        q = jnp.dot(xq, w_ref[0], preferred_element_type=jnp.float32)  # (TQ, D) f32

        # energy = Q @ K^T, contracting dim 1 of both operands (no k.T relayout).
        e = lax.dot_general(q.astype(k_ref.dtype), k_ref[...],
                            dimension_numbers=(((1,), (1,)), ((), ())),
                            preferred_element_type=jnp.float32)        # (TQ, N)
        energy_ref[0] = e                                              # pre-scale, as in torch

        # softmax(e / sqrt(E)); scale folded into the exp argument.
        m = jnp.max(e, axis=-1, keepdims=True)
        p = jnp.exp((e - m) * scale)
        denom = jnp.sum(p, axis=-1, keepdims=True)
        attn_ref[0] = p * pl.reciprocal(denom, approx=False)          # EUP reciprocal
        # TODO(synk): attention dropout omitted (identity in eval mode).

        # ctx_h = A_h @ V_h, reusing the just-stored attention block as operand.
        ctx = jnp.dot(attn_ref[0].astype(v_ref.dtype), v_ref[...],
                      preferred_element_type=jnp.float32)              # (TQ, D)
        ctx_ref[0] = ctx.astype(ctx_ref.dtype)

    return kernel


# ---------------------------------------------------------------------------
# Kernel 2: fc_out as one K=E-deep matmul + bias
# ---------------------------------------------------------------------------

def _fc_out_kernel(ctx_ref, wot_ref, b_ref, out_ref):
    # ctx_ref: (TQ2, E) compute dtype, wot_ref: (E, E) = fc_out.weight^T, b_ref: (1, E) f32
    out_ref[...] = (jnp.dot(ctx_ref[...], wot_ref[...],
                            preferred_element_type=jnp.float32)
                    + b_ref[...]).astype(out_ref.dtype)


# ---------------------------------------------------------------------------
# Wrapper
# ---------------------------------------------------------------------------

def pair_attention(pairs, wq, wk, wv, wo, bo, heads: int, *,
                   compute_dtype=jnp.bfloat16):
    """pairs: (N, E) float32. Weights use PyTorch nn.Linear convention:
    wq/wk/wv: (D, D) bias-free, wo: (E, E), bo: (E,)."""
    N, E = pairs.shape
    D = E // heads
    assert D * heads == E

    # Generation-aware VMEM ceiling and tile caps.
    vmem_cap = _vmem_capacity_bytes()
    if vmem_cap >= 96 * 1024 * 1024:        # 128 MiB parts (v5e / v6e)
        vmem_ceiling = vmem_cap - 24 * 1024 * 1024      # ~104 MiB
        max_tq = 512
    else:                                    # v7x (64 MiB per TC)
        vmem_ceiling = vmem_cap - 12 * 1024 * 1024      # ~52 MiB
        max_tq = 256
    budget = vmem_ceiling // 2

    TQ = _pick_tile(N, max_tq, lambda t: _attn_step_bytes(t, N, D) <= budget)
    n_q = N // TQ if N % TQ == 0 else 1
    if N % TQ != 0:
        TQ, n_q = N, 1

    # Head-major input and stacked (transposed) per-head projection weights.
    x_hnd = pairs.reshape(N, heads, D).transpose(1, 0, 2).astype(compute_dtype)  # (H, N, D)
    w_qkv = jnp.stack([wq.T, wk.T, wv.T], axis=0).astype(compute_dtype)          # (3, D, D)

    kernel = make_pair_attention_kernel(E, TQ)

    vmem_limit = int(min(max(2 * _attn_step_bytes(TQ, N, D), 32 * 1024 * 1024),
                         vmem_ceiling))

    cost = pl.CostEstimate(
        flops=int(2 * heads * N * D * (3 * D + 2 * N)),
        transcendentals=int(heads * N * N),
        bytes_accessed=int(2 * heads * N * D + 2 * 3 * D * D
                           + 4 * 2 * heads * N * N + 2 * heads * N * D),
    )

    energy, attn, ctx = pl.pallas_call(
        kernel,
        grid=(heads, n_q),
        in_specs=[
            pl.BlockSpec((1, N, D), lambda h, qi: (h, 0, 0)),      # all rows of head h
            pl.BlockSpec((3, D, D), lambda h, qi: (0, 0, 0)),      # stacked Wq^T/Wk^T/Wv^T
        ],
        out_specs=(
            pl.BlockSpec((1, TQ, N), lambda h, qi: (h, qi, 0)),    # energy (pre-scale)
            pl.BlockSpec((1, TQ, N), lambda h, qi: (h, qi, 0)),    # attention
            pl.BlockSpec((1, TQ, D), lambda h, qi: (h, qi, 0)),    # per-head context
        ),
        out_shape=(
            jax.ShapeDtypeStruct((heads, N, N), jnp.float32),
            jax.ShapeDtypeStruct((heads, N, N), jnp.float32),
            jax.ShapeDtypeStruct((heads, N, D), compute_dtype),
        ),
        scratch_shapes=[pltpu.VMEM((N, D), compute_dtype),         # K scratch
                        pltpu.VMEM((N, D), compute_dtype)],        # V scratch
        compiler_params=pltpu.CompilerParams(
            # heads axis is independent per-head work -> "parallel" (keeps both
            # TCs busy on v7x); query-tile axis carries the K/V scratch -> "arbitrary".
            dimension_semantics=("parallel", "arbitrary"),
            vmem_limit_bytes=vmem_limit,
        ),
        cost_estimate=cost,
    )(x_hnd, w_qkv)
    # NOTE: for very large N the 2*H*N^2 f32 energy/attn writebacks dominate;
    # callers that can accept bf16 (or skip energy) should change those
    # out_shape dtypes — kept f32 here to match the PyTorch module exactly.

    # fc_out: one K=E-deep matmul + bias on the 'qhd'-ordered context.
    ctx2 = jnp.transpose(ctx, (1, 0, 2)).reshape(N, E)              # (N, E), compute dtype
    wot = wo.T.astype(compute_dtype)                                # (E, E)
    bias = bo.reshape(1, E).astype(jnp.float32)

    TQ2 = _pick_tile(N, max_tq, lambda t: _fc_step_bytes(t, E) <= budget)
    if N % TQ2 != 0:
        TQ2 = N
    n_q2 = N // TQ2
    vmem_limit2 = int(min(max(2 * _fc_step_bytes(TQ2, E), 32 * 1024 * 1024),
                          vmem_ceiling))

    out = pl.pallas_call(
        _fc_out_kernel,
        grid=(n_q2,),
        in_specs=[
            pl.BlockSpec((TQ2, E), lambda i: (i, 0)),
            pl.BlockSpec((E, E), lambda i: (0, 0)),
            pl.BlockSpec((1, E), lambda i: (0, 0)),
        ],
        out_specs=pl.BlockSpec((TQ2, E), lambda i: (i, 0)),
        out_shape=jax.ShapeDtypeStruct((N, E), jnp.float32),
        compiler_params=pltpu.CompilerParams(
            dimension_semantics=("parallel",),
            vmem_limit_bytes=vmem_limit2,
        ),
    )(ctx2, wot, bias)

    return out, energy, attn


# ---------------------------------------------------------------------------
# Pure-JAX replica of the PyTorch forward (f32) for validation
# ---------------------------------------------------------------------------

def reference_forward(pairs, wq, wk, wv, wo, bo, heads: int):
    N, E = pairs.shape
    D = E // heads
    ph = pairs.reshape(N, heads, D)
    v = jnp.einsum('nhd,od->nho', ph, wv)
    k = jnp.einsum('nhd,od->nho', ph, wk)
    q = jnp.einsum('nhd,od->nho', ph, wq)
    energy = jnp.einsum('qhd,khd->hqk', q, k)
    attn = jax.nn.softmax(energy / math.sqrt(E), axis=2)
    out = jnp.einsum('hqk,khd->qhd', attn, v).reshape(N, E)
    out = out @ wo.T + bo
    return out, energy, attn


if __name__ == "__main__":
    # Small shapes consistent with the module: N pairs, embed_size E, H heads.
    N = 8
    embed_size = 32
    heads = 4
    head_dim = embed_size // heads

    key = jax.random.PRNGKey(0)
    kx, k1, k2, k3, k4, k5 = jax.random.split(key, 6)

    pairs = jax.random.normal(kx, (N, embed_size), dtype=jnp.float32)

    # Deterministic parameter init (same shapes as the nn.Linear weights).
    wq = jax.random.normal(k1, (head_dim, head_dim), dtype=jnp.float32) * 0.2
    wk = jax.random.normal(k2, (head_dim, head_dim), dtype=jnp.float32) * 0.2
    wv = jax.random.normal(k3, (head_dim, head_dim), dtype=jnp.float32) * 0.2
    wo = jax.random.normal(k4, (embed_size, embed_size), dtype=jnp.float32) * 0.1
    bo = jax.random.normal(k5, (embed_size,), dtype=jnp.float32) * 0.05

    out, energy, attn = pair_attention(pairs, wq, wk, wv, wo, bo, heads)
    jax.block_until_ready((out, energy, attn))

    out_ref, energy_ref, attn_ref = reference_forward(pairs, wq, wk, wv, wo, bo, heads)
    assert out.shape == (N, embed_size)
    assert energy.shape == (heads, N, N)
    assert attn.shape == (heads, N, N)
    # MXU operands are bf16 (per the perf review), so tolerances vs the f32
    # reference are correspondingly looser (~bf16 rounding of x / weights).
    assert jnp.allclose(energy, energy_ref, atol=5e-2, rtol=5e-2)
    assert jnp.allclose(attn, attn_ref, atol=2e-2, rtol=2e-2)
    assert jnp.allclose(out, out_ref, atol=3e-2, rtol=3e-2)

    print("KERNEL_OK")
</pallas_src>

<mosaic_0001>
module attributes {stable_mosaic.version = 11 : i64} {
  func.func @kernel(%arg0: i32, %arg1: i32, %arg2: memref<1x8x8xbf16, #tpu.memory_space<vmem>>, %arg3: memref<3x8x8xbf16, #tpu.memory_space<vmem>>, %arg4: memref<1x8x8xf32, #tpu.memory_space<vmem>>, %arg5: memref<1x8x8xf32, #tpu.memory_space<vmem>>, %arg6: memref<1x8x8xbf16, #tpu.memory_space<vmem>>, %arg7: memref<8x8xbf16, #tpu.memory_space<vmem>>, %arg8: memref<8x8xbf16, #tpu.memory_space<vmem>>) attributes {dimension_semantics = [#tpu.dimension_semantics<parallel>, #tpu.dimension_semantics<arbitrary>], iteration_bounds = array<i64: 4, 1>, scalar_prefetch = 0 : i64, scratch_operands = 2 : i64, tpu.core_type = #tpu.core_type<tc>, window_params = [{transform_indices = @transform_0, window_bounds = array<i64: 1, 8, 8>}, {pipeline_mode = #tpu.pipeline_mode<synchronous>, transform_indices = @transform_1, window_bounds = array<i64: 3, 8, 8>}, {transform_indices = @transform_2, window_bounds = array<i64: 1, 8, 8>}, {transform_indices = @transform_3, window_bounds = array<i64: 1, 8, 8>}, {transform_indices = @transform_4, window_bounds = array<i64: 1, 8, 8>}]} {
    %c0_i32 = arith.constant 0 : i32
    %0 = arith.cmpi eq, %arg1, %c0_i32 : i32
    %1 = arith.extui %0 : i1 to i32
    %c0_i32_0 = arith.constant 0 : i32
    %2 = arith.cmpi ne, %1, %c0_i32_0 : i32
    scf.if %2 {
      %c0_26 = arith.constant 0 : index
      %c0_27 = arith.constant 0 : index
      %c0_28 = arith.constant 0 : index
      %41 = vector.load %arg2[%c0_26, %c0_27, %c0_28] : memref<1x8x8xbf16, #tpu.memory_space<vmem>>, vector<1x8x8xbf16>
      %42 = vector.shape_cast %41 : vector<1x8x8xbf16> to vector<8x8xbf16>
      %c1 = arith.constant 1 : index
      %c0_29 = arith.constant 0 : index
      %c0_30 = arith.constant 0 : index
      %43 = vector.load %arg3[%c1, %c0_29, %c0_30] : memref<3x8x8xbf16, #tpu.memory_space<vmem>>, vector<1x8x8xbf16>
      %44 = vector.shape_cast %43 : vector<1x8x8xbf16> to vector<8x8xbf16>
      %cst_31 = arith.constant dense<0.000000e+00> : vector<8x8xf32>
      %45 = tpu.matmul %42, %44, %cst_31 {dimension_numbers = #tpu.dot_dimension_numbers<[1], [0], [0], [1], [0, 0, 1, 1], [], []>} : vector<8x8xbf16>, vector<8x8xbf16>, vector<8x8xf32> -> vector<8x8xf32>
      %46 = arith.truncf %45 : vector<8x8xf32> to vector<8x8xbf16>
      %c0_32 = arith.constant 0 : index
      %c0_33 = arith.constant 0 : index
      %47 = vector.load %arg7[%c0_32, %c0_33] : memref<8x8xbf16, #tpu.memory_space<vmem>>, vector<8x8xbf16>
      tpu.vector_store %arg7[%c0_32, %c0_33], %46 {strides = array<i32>} : memref<8x8xbf16, #tpu.memory_space<vmem>>, vector<8x8xbf16>,
      %c2 = arith.constant 2 : index
      %c0_34 = arith.constant 0 : index
      %c0_35 = arith.constant 0 : index
      %48 = vector.load %arg3[%c2, %c0_34, %c0_35] : memref<3x8x8xbf16, #tpu.memory_space<vmem>>, vector<1x8x8xbf16>
      %49 = vector.shape_cast %48 : vector<1x8x8xbf16> to vector<8x8xbf16>
      %cst_36 = arith.constant dense<0.000000e+00> : vector<8x8xf32>
      %50 = tpu.matmul %42, %49, %cst_36 {dimension_numbers = #tpu.dot_dimension_numbers<[1], [0], [0], [1], [0, 0, 1, 1], [], []>} : vector<8x8xbf16>, vector<8x8xbf16>, vector<8x8xf32> -> vector<8x8xf32>
      %51 = arith.truncf %50 : vector<8x8xf32> to vector<8x8xbf16>
      %c0_37 = arith.constant 0 : index
      %c0_38 = arith.constant 0 : index
      %52 = vector.load %arg8[%c0_37, %c0_38] : memref<8x8xbf16, #tpu.memory_space<vmem>>, vector<8x8xbf16>
      tpu.vector_store %arg8[%c0_37, %c0_38], %51 {strides = array<i32>} : memref<8x8xbf16, #tpu.memory_space<vmem>>, vector<8x8xbf16>,
    } else {
    }
    %c8_i32 = arith.constant 8 : i32
    %3 = arith.muli %arg1, %c8_i32 : i32
    %4 = tpu.assume_multiple %3, 8 : i32
    %c0 = arith.constant 0 : index
    %5 = arith.index_cast %4 : i32 to index
    %c0_1 = arith.constant 0 : index
    %6 = vector.load %arg2[%c0, %5, %c0_1] : memref<1x8x8xbf16, #tpu.memory_space<vmem>>, vector<1x8x8xbf16>
    %7 = vector.shape_cast %6 : vector<1x8x8xbf16> to vector<8x8xbf16>
    %c0_2 = arith.constant 0 : index
    %c0_3 = arith.constant 0 : index
    %c0_4 = arith.constant 0 : index
    %8 = vector.load %arg3[%c0_2, %c0_3, %c0_4] : memref<3x8x8xbf16, #tpu.memory_space<vmem>>, vector<1x8x8xbf16>
    %9 = vector.shape_cast %8 : vector<1x8x8xbf16> to vector<8x8xbf16>
    %cst = arith.constant dense<0.000000e+00> : vector<8x8xf32>
    %10 = tpu.matmul %7, %9, %cst {dimension_numbers = #tpu.dot_dimension_numbers<[1], [0], [0], [1], [0, 0, 1, 1], [], []>} : vector<8x8xbf16>, vector<8x8xbf16>, vector<8x8xf32> -> vector<8x8xf32>
    %11 = arith.truncf %10 : vector<8x8xf32> to vector<8x8xbf16>
    %c0_5 = arith.constant 0 : index
    %c0_6 = arith.constant 0 : index
    %12 = vector.load %arg7[%c0_5, %c0_6] : memref<8x8xbf16, #tpu.memory_space<vmem>>, vector<8x8xbf16>
    %cst_7 = arith.constant dense<0.000000e+00> : vector<8x8xf32>
    %13 = tpu.matmul %11, %12, %cst_7 {dimension_numbers = #tpu.dot_dimension_numbers<[1], [1], [0], [0], [0, 0, 1, 0], [], []>} : vector<8x8xbf16>, vector<8x8xbf16>, vector<8x8xf32> -> vector<8x8xf32>
    %c0_8 = arith.constant 0 : index
    %c0_9 = arith.constant 0 : index
    %c0_10 = arith.constant 0 : index
    %14 = vector.load %arg4[%c0_8, %c0_9, %c0_10] : memref<1x8x8xf32, #tpu.memory_space<vmem>>, vector<1x8x8xf32>
    %15 = vector.shape_cast %14 : vector<1x8x8xf32> to vector<8x8xf32>
    %16 = vector.shape_cast %13 : vector<8x8xf32> to vector<1x8x8xf32>
    tpu.vector_store %arg4[%c0_8, %c0_9, %c0_10], %16 {strides = array<i32>} : memref<1x8x8xf32, #tpu.memory_space<vmem>>, vector<1x8x8xf32>,
    %cst_11 = arith.constant dense<0xFF800000> : vector<8xf32>
    %17 = vector.multi_reduction <maximumf>, %13, %cst_11 [1] : vector<8x8xf32> to vector<8xf32>
    %18 = vector.shape_cast %17 : vector<8xf32> to vector<8x1xf32>
    %19 = vector.broadcast %18 : vector<8x1xf32> to vector<8x8xf32>
    %20 = arith.subf %13, %19 : vector<8x8xf32>
    %cst_12 = arith.constant 0.176776692 : f32
    %21 = vector.broadcast %cst_12 : f32 to vector<8x8xf32>
    %22 = arith.mulf %20, %21 : vector<8x8xf32>
    %23 = math.exp %22 : vector<8x8xf32>
    %cst_13 = arith.constant dense<0.000000e+00> : vector<8xf32>
    %24 = vector.multi_reduction <add>, %23, %cst_13 [1] : vector<8x8xf32> to vector<8xf32>
    %25 = vector.shape_cast %24 : vector<8xf32> to vector<8x1xf32>
    %26 = tpu.reciprocal %25 : vector<8x1xf32> -> vector<8x1xf32>
    %27 = vector.broadcast %26 : vector<8x1xf32> to vector<8x8xf32>
    %28 = arith.mulf %23, %27 : vector<8x8xf32>
    %c0_14 = arith.constant 0 : index
    %c0_15 = arith.constant 0 : index
    %c0_16 = arith.constant 0 : index
    %29 = vector.load %arg5[%c0_14, %c0_15, %c0_16] : memref<1x8x8xf32, #tpu.memory_space<vmem>>, vector<1x8x8xf32>
    %30 = vector.shape_cast %29 : vector<1x8x8xf32> to vector<8x8xf32>
    %31 = vector.shape_cast %28 : vector<8x8xf32> to vector<1x8x8xf32>
    tpu.vector_store %arg5[%c0_14, %c0_15, %c0_16], %31 {strides = array<i32>} : memref<1x8x8xf32, #tpu.memory_space<vmem>>, vector<1x8x8xf32>,
    %c0_17 = arith.constant 0 : index
    %c0_18 = arith.constant 0 : index
    %c0_19 = arith.constant 0 : index
    %32 = vector.load %arg5[%c0_17, %c0_18, %c0_19] : memref<1x8x8xf32, #tpu.memory_space<vmem>>, vector<1x8x8xf32>
    %33 = vector.shape_cast %32 : vector<1x8x8xf32> to vector<8x8xf32>
    %34 = arith.truncf %33 : vector<8x8xf32> to vector<8x8xbf16>
    %c0_20 = arith.constant 0 : index
    %c0_21 = arith.constant 0 : index
    %35 = vector.load %arg8[%c0_20, %c0_21] : memref<8x8xbf16, #tpu.memory_space<vmem>>, vector<8x8xbf16>
    %cst_22 = arith.constant dense<0.000000e+00> : vector<8x8xf32>
    %36 = tpu.matmul %34, %35, %cst_22 {dimension_numbers = #tpu.dot_dimension_numbers<[1], [0], [0], [1], [0, 0, 1, 1], [], []>} : vector<8x8xbf16>, vector<8x8xbf16>, vector<8x8xf32> -> vector<8x8xf32>
    %37 = arith.truncf %36 : vector<8x8xf32> to vector<8x8xbf16>
    %c0_23 = arith.constant 0 : index
    %c0_24 = arith.constant 0 : index
    %c0_25 = arith.constant 0 : index
    %38 = vector.load %arg6[%c0_23, %c0_24, %c0_25] : memref<1x8x8xbf16, #tpu.memory_space<vmem>>, vector<1x8x8xbf16>
    %39 = vector.shape_cast %38 : vector<1x8x8xbf16> to vector<8x8xbf16>
    %40 = vector.shape_cast %37 : vector<8x8xbf16> to vector<1x8x8xbf16>
    tpu.vector_store %arg6[%c0_23, %c0_24, %c0_25], %40 {strides = array<i32>} : memref<1x8x8xbf16, #tpu.memory_space<vmem>>, vector<1x8x8xbf16>,
    return
  }
  func.func @transform_0(%arg0: i32, %arg1: i32) -> (i32, i32, i32) {
    %c0_i32 = arith.constant 0 : i32
    %c0_i32_0 = arith.constant 0 : i32
    %c0_i32_1 = arith.constant 0 : i32
    return %arg0, %c0_i32, %c0_i32_0 : i32, i32, i32
  }
  func.func @transform_1(%arg0: i32, %arg1: i32) -> (i32, i32, i32) {
    %c0_i32 = arith.constant 0 : i32
    %c0_i32_0 = arith.constant 0 : i32
    %c0_i32_1 = arith.constant 0 : i32
    %c0_i32_2 = arith.constant 0 : i32
    return %c0_i32, %c0_i32_0, %c0_i32_1 : i32, i32, i32
  }
  func.func @transform_2(%arg0: i32, %arg1: i32) -> (i32, i32, i32) {
    %c0_i32 = arith.constant 0 : i32
    %c0_i32_0 = arith.constant 0 : i32
    return %arg0, %arg1, %c0_i32 : i32, i32, i32
  }
  func.func @transform_3(%arg0: i32, %arg1: i32) -> (i32, i32, i32) {
    %c0_i32 = arith.constant 0 : i32
    %c0_i32_0 = arith.constant 0 : i32
    return %arg0, %arg1, %c0_i32 : i32, i32, i32
  }
  func.func @transform_4(%arg0: i32, %arg1: i32) -> (i32, i32, i32) {
    %c0_i32 = arith.constant 0 : i32
    %c0_i32_0 = arith.constant 0 : i32
    return %arg0, %arg1, %c0_i32 : i32, i32, i32
  }
}

</mosaic_0001>

<bundles_post_ra>
// kernel: tpu_custom_call.1
= control target key start
LH: loop header
LB: loop body
LE: loop exit
PB: predicated region body
PF: predicated region fallthrough
CT: control target
= control target key end

     0   :  { %s1192_s0 = inlined_call_operand.hbm [shape: bf16[4,8,8], index: 0, kind: input, shape index: {}]   ;;  %s1193_s1 = inlined_call_operand.hbm [shape: bf16[3,8,8], index: 1, kind: input, shape index: {}]   ;;  %s1194_s2 = inlined_call_operand.hbm [shape: f32[4,8,8], index: 2, kind: output, shape index: {0}]   ;;  %s1195_s3 = inlined_call_operand.hbm [shape: f32[4,8,8], index: 3, kind: output, shape index: {1}]   ;;  %s1196_s4 = inlined_call_operand.hbm [shape: bf16[4,8,8], index: 4, kind: output, shape index: {2}]  }
   0x1   :  { %1199 = sst [smem:[#allocation17_spill]] %s1192_s0 }
   0x2   :  { %10 = vsyncpa [#allocation5], 0 }
   0x3   :  { %12 = vsyncpa [#allocation5 + $0x1], 0 }
   0x4   :  { %13 = vsyncpa [#allocation8], 0 }
   0x5   :  { %14 = vsyncpa [#allocation6], 0 }
   0x6   :  { %16 = vsyncpa [#allocation6 + $0x1], 0 }
   0x7   :  { %17 = vsyncpa [#allocation11], 0 }
   0x8   :  { %19 = vsyncpa [#allocation11 + $0x1], 0  ;;  %s985_s15 = smov 0   ;;  %s987_s16 = smov 0  }
   0x9   :  { %s989_s17 = smov 0   ;;  %s991_s18 = smov 0  }
   0xa   :  { %s993_s19 = smov 0   ;;  %s995_s20 = smov 0  }
   0xb LB: > { %s1016_s21 = sadd.s32 4294967295, %s955_s20   ;;  %p636_p0 = scmp.ge.s32.totalorder %s955_s20, 1  ;;  %s955_s20 = sphi %s995_s20, %s25_s20   ;;  %s951_s19 = sphi %s993_s19, %s1212_s19   ;;  %s947_s18 = sphi %s991_s18, %s1211_s18   ;;  %s943_s17 = sphi %s989_s17, %s1210_s17   ;;  %s939_s16 = sphi %s987_s16, %s1209_s16   ;;  %s935_s15 = sphi %s985_s15, %s1208_s15  }
   0xc   : > { %p58_p1 = scmp.eq.s32.totalorder %s1016_s21, 0  ;;  %p173_p2 = scmp.lt.s32.totalorder %s955_s20, 5 }
   0xd   : > { %s184_s24 = sshll.u32 %s1193_s1, 4  ;;  %s957_s26 = smov [#allocation7]   ;;  %s185_s24 = int_to_ptr.hbm [resolvable:$true] %s184_s24 }
   0xe   : > { %p1024_p3 = pnand %p636_p0, %p173_p2  ;;  %s186_s27 = sshll.u32 %s957_s26, 4  ;;  %s187_s27 = int_to_ptr.vmem [resolvable:$true] %s186_s27 }
   0xf   : > { %s958_s28 = smov 64   ;;  %s959_s29 = smov 4  }
  0x10   : > { %p672_p4 = pneg %p1024_p3  ;;  %s1197_s30 = sadd.s32 4294967294, %s955_s20  }
  0x11   : > { %s37_s5 = sadd.s32 1, %s951_s19  ;;  %s44_s6 = sadd.s32 1, %s943_s17 }
  0x12   : > { %p673_p5 = pnand %p672_p4, %p58_p1  ;;  %p39_p6 = scmp.ge.s32.totalorder %s37_s5, 4 }
  0x13   : > { %p51_p7 = scmp.ne.s32.totalorder %s943_s17, %s939_s16  ;;  %p52_p8 = scmp.eq.s32.totalorder %s955_s20, 0 }
  0x14   : > { %675 = dma.hbm_to_vmem [thread:$0]  (!%p673_p5), %s185_s24, 192, %s187_s27, [#allocation8], %s958_s28, %s958_s28, %s959_s29  }
  0x15   : > { %p57_p9 = scmp.ne.s32.totalorder %s939_s16, %s935_s15  ;;  %s1214_s5 = smov (%p39_p6, %s37_s5), 0 }
  0x16   : > { %p1042_p10 = por %p52_p8, %p51_p7  ;;  %s41_s9 = ssub.s32 %s951_s19, %s1214_s5 }
  0x17   : > { %p1048_p11 = por %p58_p1, %p57_p9  ;;  %p104_p12 = scmp.eq.s32.totalorder %s1016_s21, 3 }
  0x18   : > { %p42_p13 = scmp.eq.s32.totalorder %s41_s9, 0  ;;  %p110_p0 = scmp.eq.s32.totalorder %s1197_s30, 3 }
  0x19   : > { %p1057_p2 = por %p104_p12, %p51_p7  ;;  %p691_p4 = scmp.lt.s32.totalorder %s955_s20, 4 }
  0x1a   : > { %s1063_s11 = scalar_select %p42_p13, %s943_s17, %s44_s6  }
  0x1b   : > { %p1065_p5 = por %p110_p0, %p57_p9  ;;  %s200_s13 = sand.u32 1, %s943_s17  }
  0x1c   : > { %s639_s14 = sshll.u32 %s200_s13, 2  ;;  %s640_s22 = sshll.u32 %s951_s19, 2 }
  0x1d   : > { %s1205_s0 = sld [smem:[#allocation17_spill]]  ;;  %s204_s27 = scalar_lea.vmem [#allocation4], %s639_s14 }
  0x1e   : > { %s212_s28 = sshll.u32 %s204_s27, 4  ;;  %p677_p6 = pnand %p691_p4, %p1042_p10  ;;  %s213_s28 = int_to_ptr.vmem [resolvable:$true] %s212_s28 }
  0x1f   : > { %s201_s6 = scalar_lea.sflag [#allocation5], %s200_s13  ;;  %s1079_s9 = sand.u32 (!%p1024_p3), 1, %s939_s16  }
  0x20   : > { %s224_s14 = scalar_lea.sflag (!%p1024_p3), [#allocation5], %s1079_s9 }
  0x21   : > { %221 = sbr.rel (%p1024_p3) target bundleno = 732 (0x2dc), region = 28 }
  0x23   : > { %s208_s26 = scalar_lea.hbm %s1205_s0, %s640_s22  ;;  %s1198_s22 = sshll.u32 (!%p1024_p3), %s1079_s9, 2 }
  0x24   : > { %s210_s29 = sshll.u32 %s208_s26, 4  ;;  %s227_s23 = scalar_lea.vmem (!%p1024_p3), [#allocation4], %s1198_s22  ;;  %s211_s29 = int_to_ptr.hbm [resolvable:$true] %s210_s29 }
  0x25   : > { %679 = dma.hbm_to_vmem [thread:$0]  (!%p677_p6), %s211_s29, 64, %s213_s28, %s201_s6  }
  0x26   : > { %918 = dma.done.wait (%p1048_p11), %s224_s14, 64  }
  0x27   : > { %920 = vsyncadd (%p1048_p11), %s224_s14, 4294967232 }
  0x28   : > { %922 = dma.done.wait (%p58_p1), [#allocation8], 192  }
  0x29   : > { %924 = vsyncadd (%p58_p1), [#allocation8], 4294967104  ;;  %vm280_vm0 = vcmask 1043456   ;;  %v275_v0 = vld [vmem:[#allocation7 + $0x4] sm:$0xf]  ;;  %vm276_vm1 = vcmask 64512  }
  0x2a   : > { %v326_v1 = vld [vmem:[#allocation7] sm:$0xf]  ;;  %v282_v2 = vsel %vm280_vm0, %v275_v0, 0  ;;  %v273_v4 = vld [vmem:[%s227_s23] sm:$0xf]  ;;  %vm298_vm2 = vcmask 60416  }
  0x2b   : > { %v333_v3 = vsel %vm280_vm0, %v326_v1, 0  ;;  %291 = vmatpush.bf16.msra.mxu0 %v282_v2  ;;  %v325_v5 = vld [vmem:[%s227_s23] sm:$0xf]  ;;  %v301_v14 = vld [vmem:[#allocation7 + $0x8] sm:$0xf]  ;;  %s644_s25 = sshll.u32 %s1079_s9, 3 }
  0x2c   : > { %342 = vmatpush.bf16.msra.mxu2 %v333_v3  ;;  %v303_v15 = vsel %vm280_vm0, %v301_v14, 0  ;;  %s1105_s7 = scalar_lea.vmem [#allocation9], %s644_s25  ;;  %s260_s8 = scalar_lea.vmem [#allocation10], %s644_s25 }
  0x2d   : > { %312 = vmatpush.bf16.msra.mxu1 %v303_v15  ;;  %s426_s13 = sand.u32 1, %s1016_s21   ;;  %s655_s24 = sshll.u32 %s947_s18, 3 }
  0x2e   : > { %647 = vmatmul.msk.bf16.vlgmr.msra.gmra.mxu0 %vm276_vm1, %v273_v4  ;;  %s458_s28 = scalar_lea.hbm %s1195_s3, %s655_s24  ;;  %s460_s29 = sshll.u32 %s260_s8, 4  ;;  %s461_s29 = int_to_ptr.vmem [resolvable:$true] %s460_s29 }
  0x2f   : > { %649 = vmatmul.msk.bf16.vlgmr.msra.gmra.mxu2 %vm276_vm1, %v325_v5  ;;  %s462_s6 = sshll.u32 %s458_s28, 4  ;;  %s1122_s14 = scalar_lea.sflag [#allocation11], %s426_s13  ;;  %s463_s6 = int_to_ptr.hbm [resolvable:$true] %s462_s6 }
  0x30   : > { %648 = vmatmul.msk.bf16.vlgmr.msra.gmra.mxu1 %vm276_vm1, %v273_v4  ;;  %s823_s23 = sshra.s32 %s463_s6, 4  ;;  %s829_s26 = scalar_lea.hbm %s1195_s3, 32  ;;  %s824_s23 = int_to_ptr.hbm [resolvable:$true] %s823_s23 }
  0x31   : > { %s825_s25 = scalar_lea.hbm %s824_s23, 8  ;;  %p830_p8 = scmp.lt.s32.totalorder %s824_s23, %s1195_s3 }
  0x32   : > { %p826_p1 = scmp.ne.s32.totalorder %s824_s23, %s825_s25  ;;  %p831_p9 = scmp.lt.s32.totalorder %s829_s26, %s825_s25 }
  0x34   : > { %p827_p3 = pnand %p826_p1, %p1057_p2  ;;  %p832_p10 = por %p831_p9, %p830_p8 }
  0x36   : > { %p828_p7 = pneg %p827_p3 }
  0x38   : > { %p833_p11 = pnand %p832_p10, %p828_p7 }
  0xab   : > { %v293_v6 = vpop.f32.mrf.mxu0 }
  0xac   : > { %v297_v7 = vpack.c.bf16 %v293_v6, %v293_v6 }
  0xad   : > { %v314_v19 = vpop.f32.mrf.mxu1 }
  0xae   : > { %299 = vst.msk [vmem:[#allocation2] sm:$0xf] %vm298_vm2, %v297_v7  ;;  %v318_v20 = vpack.c.bf16 %v314_v19, %v314_v19 }
  0xb0   : > { %319 = vst.msk [vmem:[#allocation3] sm:$0xf] %vm298_vm2, %v318_v20 }
  0xb2   : > { %v344_v8 = vpop.f32.mrf.mxu2 }
  0xb3   : > { %v295_v9 = vpop.f32.mrf.mxu0  ;;  %v348_v13 = vpack.c.bf16 %v344_v8, %v344_v8 }
  0xb5   : > { %v349_v10 = vld [vmem:[#allocation2] sm:$0xf]  ;;  %v316_v21 = vpop.f32.mrf.mxu1 }
  0xb6   : > { %v354_v11 = vsel %vm276_vm1, %v349_v10, 0 }
  0xb7   : > { %363 = vmatpush.bf16.xpose.msra.mxu3 %v354_v11  ;;  %v398_v28 = vld [vmem:[#allocation3] sm:$0xf] }
  0xb8   : > { %v403_v29 = vsel %vm280_vm0, %v398_v28, 0 }
  0xb9   : > { %412 = vmatpush.bf16.msrb.mxu0 %v403_v29 }
  0xba   : > { %v346_v12 = vpop.f32.mrf.mxu2 }
  0xbe   : > { %650 = vmatmul.msk.bf16.vlgmr.msra.gmra.mxu3 %vm276_vm1, %v348_v13 }
 0x141   : > { %v365_v16 = vpop.f32.mrf.mxu3 }
 0x142   : > { %369 = vst.msk [vmem:[%s1105_s7] sm:$0xff] %vm276_vm1, %v365_v16  ;;  %v370_v17 = vsel %vm276_vm1, %v365_v16, -inf }
 0x143   : > { %371 = vmax.xlane.f32.xlu0 %v370_v17 }
 0x149   : > { %v367_v18 = vpop.f32.mrf.mxu3 }
 0x1b6   : > { %v372_v22 = vpop.xlane.xlu0 %371 }
 0x1b7   : > { %v373_v23 = vsub.f32 %v365_v16, %v372_v22 }
 0x1b9   : > { %v374_v24 = vmul.f32 0.17677669, %v373_v23 }
 0x1bb   : > { %v375_v25 = vmul.f32 1.442695, %v374_v24 }
 0x1bd   : > { %745 = vpow2.f32 %v375_v25 }
 0x1c3   : > { %v746_v26 = vpop.eup %745 }
 0x1c4   : > { %v377_v27 = vsel %vm276_vm1, %v746_v26, 0.0 }
 0x1c5   : > { %378 = vadd.xlane.f32.xlu0 %v377_v27 }
 0x238   : > { %v379_v30 = vpop.xlane.xlu0 %378 }
 0x239   : > { %747 = vrcp.f32 %v379_v30  ;;  %v391_v34 = vand.u32 2147483648, %v379_v30  ;;  %v389_v36 = vand.u32 2147483647, %v379_v30  ;;  %vm385_vm4 = vweird.f32 %v379_v30 }
 0x23b   : > { %v392_v38 = vor.u32 1.1754944e-38, %v391_v34  ;;  %vm390_vm6 = vcmp.eq.f32.partialorder %v389_v36, 8.507059e+37 }
 0x23f   : > { %v748_v31 = vpop.eup %747 }
 0x240   : > { %v381_v32 = vmul.f32 %v748_v31, %v379_v30  ;;  %vm386_vm3 = vweird.f32 %v748_v31 }
 0x241   : > { %vm387_vm5 = vmor %vm385_vm4, %vm386_vm3 }
 0x242   : > { %v382_v33 = vsub.f32 1.0, %v381_v32 }
 0x244   : > { %v383_v35 = vmul.f32 %v748_v31, %v382_v33 }
 0x246   : > { %v384_v37 = vadd.f32 %v748_v31, %v383_v35 }
 0x248   : > { %v388_v39 = vsel %vm387_vm5, %v748_v31, %v384_v37 }
 0x249   : > { %v393_v40 = vsel %vm390_vm6, %v392_v38, %v388_v39 }
 0x24a   : > { %v394_v41 = vmul.f32 %v746_v26, %v393_v40 }
 0x24c   : > { %395 = vst.msk [vmem:[%s260_s8] sm:$0xff] %vm276_vm1, %v394_v41 }
 0x253   : > { %v396_v42 = vld [vmem:[%s260_s8] sm:$0xff] }
 0x254   : > { %v397_v43 = vpack.c.bf16 %v396_v42, %v396_v42 }
 0x256   : > { %651 = vmatmul.msk.bf16.vlgmr.msrb.gmra.mxu0 %vm276_vm1, %v397_v43 }
 0x257   : > { %836 = shalt.err (!%p833_p11)
}
 0x258   : > { %667 = dma.vmem_to_hbm [thread:$0]  (%p1057_p2), %s461_s29, 128, %s463_s6, %s1122_s14  }
 0x259   : > { %s443_s30 = scalar_lea.hbm %s1194_s2, %s655_s24  ;;  %s445_s28 = sshll.u32 %s1105_s7, 4  ;;  %s446_s28 = int_to_ptr.vmem [resolvable:$true] %s445_s28 }
 0x25a   : > { %s447_s21 = sshll.u32 %s443_s30, 4  ;;  %s422_s22 = scalar_lea.sflag [#allocation6], %s1079_s9  ;;  %s448_s21 = int_to_ptr.hbm [resolvable:$true] %s447_s21 }
 0x25b   : > { %s851_s23 = sshra.s32 %s448_s21, 4  ;;  %s857_s29 = scalar_lea.hbm %s1194_s2, 32  ;;  %s852_s23 = int_to_ptr.hbm [resolvable:$true] %s851_s23 }
 0x25c   : > { %s853_s25 = scalar_lea.hbm %s852_s23, 8  ;;  %p858_p4 = scmp.lt.s32.totalorder %s852_s23, %s1194_s2 }
 0x25d   : > { %p854_p12 = scmp.ne.s32.totalorder %s852_s23, %s853_s25  ;;  %p859_p6 = scmp.lt.s32.totalorder %s857_s29, %s853_s25 }
 0x25f   : > { %p855_p13 = pnand %p854_p12, %p1057_p2  ;;  %p860_p1 = por %p859_p6, %p858_p4 }
 0x261   : > { %p856_p0 = pneg %p855_p13 }
 0x263   : > { %p861_p3 = pnand %p860_p1, %p856_p0 }
 0x265   : > { %864 = shalt.err (!%p861_p3)
}
 0x266   : > { %666 = dma.vmem_to_hbm [thread:$0]  (%p1057_p2), %s446_s28, 128, %s448_s21, %s422_s22  }
 0x267   : > { %s657_s7 = sshll.u32 %s947_s18, 2  ;;  %s1206_s30 = sshll.u32 %s1079_s9, 2 }
 0x268   : > { %s473_s13 = scalar_lea.hbm %s1196_s4, %s657_s7  ;;  %s267_s26 = scalar_lea.vmem [#allocation12], %s1206_s30 }
 0x269   : > { %s475_s27 = sshll.u32 %s267_s26, 4  ;;  %s477_s0 = sshll.u32 %s473_s13, 4  ;;  %s476_s27 = int_to_ptr.vmem [resolvable:$true] %s475_s27  ;;  %s478_s0 = int_to_ptr.hbm [resolvable:$true] %s477_s0 }
 0x26a   : > { %s879_s23 = sshra.s32 %s478_s0, 4  ;;  %s885_s9 = scalar_lea.hbm %s1196_s4, 16  ;;  %s880_s23 = int_to_ptr.hbm [resolvable:$true] %s879_s23 }
 0x26b   : > { %s881_s25 = scalar_lea.hbm %s880_s23, 4  ;;  %p886_p10 = scmp.lt.s32.totalorder %s880_s23, %s1196_s4 }
 0x26c   : > { %p882_p7 = scmp.ne.s32.totalorder %s880_s23, %s881_s25  ;;  %p887_p11 = scmp.lt.s32.totalorder %s885_s9, %s881_s25 }
 0x26e   : > { %p883_p8 = pnand %p882_p7, %p1057_p2  ;;  %p888_p12 = por %p887_p11, %p886_p10 }
 0x270   : > { %p884_p9 = pneg %p883_p8 }
 0x272   : > { %p889_p13 = pnand %p888_p12, %p884_p9 }
 0x2d3   : > { %v414_v44 = vpop.f32.mrf.mxu0 }
 0x2d4   : > { %v418_v45 = vpack.c.bf16 %v414_v44, %v414_v44 }
 0x2d6   : > { %420 = vst.msk [vmem:[%s267_s26] sm:$0xf] %vm298_vm2, %v418_v45 }
 0x2d7   : > { %892 = shalt.err (!%p889_p13)
}
 0x2d8   : > { %668 = dma.vmem_to_hbm [thread:$0]  (%p1057_p2), %s476_s27, 64, %s478_s0, %s1122_s14  }
 0x2db   : > { %v416_v46 = vpop.f32.mrf.mxu0 }
 0x2dc PF: > { %p693_p0 = scmp.ge.s32.totalorder %s955_s20, 2  ;;  %s489_s29 = sand.u32 1, %s935_s15  }
 0x2dd   : > { %s490_s6 = scalar_lea.sflag [#allocation6], %s489_s29 }
 0x2de   : > { %p681_p4 = pnand %p693_p0, %p1065_p5 }
 0x2e0   : > { %p682_p6 = pneg %p681_p4 }
 0x2e2   : > { %926 = dma.done.wait (%p682_p6), %s490_s6, 128  }
 0x2e3   : > { %928 = vsyncadd (%p682_p6), %s490_s6, 4294967168  ;;  %s1207_s7 = sadd.s32 4294967294, %s955_s20  }
 0x2e4   : > { %s499_s24 = sand.u32 1, %s1207_s7  }
 0x2e5   : > { %s500_s8 = scalar_lea.sflag [#allocation11], %s499_s24 }
 0x2e6   : > { %930 = dma.done.wait (%p682_p6), %s500_s8, 192  }
 0x2e7   : > { %932 = vsyncadd (%p682_p6), %s500_s8, 4294967104  ;;  %s25_s20 = sadd.s32 1, %s955_s20   ;;  %s1208_s15 = smov %s939_s16 }
 0x2e8   : > { %p22_p2 = scmp.ge.s32.totalorder %s25_s20, 6   ;;  %s1209_s16 = smov %s943_s17 }
 0x2e9   : > { %s1210_s17 = smov %s1063_s11  ;;  %s1211_s18 = smov %s951_s19 }
 0x2ea   : > { %s1212_s19 = smov %s1214_s5  ;;  %24 = sbr.rel (!%p22_p2) target bundleno = 11 (0xb), region = 116 }
 0x2ef   :  { %516 = vsyncpa [#allocation5], 1 }
 0x2f0   :  { %518 = vsyncpa [#allocation5 + $0x1], 1 }
 0x2f1   :  { %519 = vsyncpa [#allocation8], 1 }
 0x2f2   :  { %520 = vsyncpa [#allocation6], 1 }
 0x2f3   :  { %522 = vsyncpa [#allocation6 + $0x1], 1 }
 0x2f4   :  { %523 = vsyncpa [#allocation11], 1 }
 0x2f5   :  { %525 = vsyncpa [#allocation11 + $0x1], 1 }

</bundles_post_ra>
